<compile_context>
chip_gen: v7x
topology: tpu7x:2x2x1
jax: 0.10.0
libtpu: 0.0.40
codegen_flags: <defaults>
</compile_context>

<pallas_src>
import functools
import math

import jax
import jax.numpy as jnp
from jax.experimental import pallas as pl
from jax.experimental.pallas import tpu as pltpu


def _round_up(v, m):
    return ((v + m - 1) // m) * m


def _vmem_budget_and_limit():
    """Generation-aware VMEM planning budget and compiler vmem-limit cap."""
    try:
        cap = int(pltpu.get_tpu_info().vmem_capacity_bytes)  # 128 MiB v5e/v6e, 64 MiB v7x
    except Exception:
        cap = 64 * 1024 * 1024                               # conservative fallback
    cap = max(cap, 32 * 1024 * 1024)
    budget = cap - 16 * 1024 * 1024       # planning budget (Mosaic internal-scratch headroom)
    limit_cap = cap - 8 * 1024 * 1024     # never hand Mosaic the full physical VMEM
    return budget, limit_cap


def _estimate_vmem(tm, tk, fe_pad, fo_pad, adj_bytes, feat_bytes, out_bytes,
                   w_bytes, num_k):
    """VMEM footprint; x2 on every BlockSpec operand = default double buffering."""
    est = 2 * (tm * tk * adj_bytes            # adjacency tile
               + tk * fe_pad * feat_bytes     # aggregation operand (k tile / resident)
               + tm * fe_pad * feat_bytes     # self rows (the +I fold)
               + w_bytes                      # weight (aggregate-first path only)
               + 8 * fo_pad * 4               # bias (sublane padded)
               + tm * fo_pad * out_bytes)     # output tile
    if num_k > 1:
        est += tm * fe_pad * 4 + tm * 128 * 4  # f32 accumulator (+ degree) scratch
    return est


_POW2_ROW = (1024, 512, 256, 128, 64, 32, 16, 8)
_POW2_COL = (1024, 512, 256, 128)


def _select_tiles(n, fe_pad, fo_pad, adj_bytes, feat_bytes, out_bytes, w_bytes,
                  budget, max_row_tile):
    """Pick (tm, tk, n_pad, est).

    Prefer the smallest n_pad (adjacency traffic is O(n_pad^2)), then the
    largest row tile; prefer a single resident-feats pass over K-tiling.
    All tiles are powers of two so they divide the 128-aligned n_pad.
    """
    n128 = _round_up(max(n, 1), 128)
    row_tiles = [t for t in _POW2_ROW if t <= max_row_tile and t <= n128] or [8]

    # 1) Single pass with the full feature/support matrix resident in VMEM.
    cands = []
    for tm in row_tiles:
        n_pad = _round_up(n, max(tm, 128))
        est = _estimate_vmem(tm, n_pad, fe_pad, fo_pad, adj_bytes, feat_bytes,
                             out_bytes, w_bytes, 1)
        if est <= budget:
            cands.append(((n_pad, -tm), (tm, n_pad, n_pad, est)))
    if cands:
        return min(cands)[1]

    # 2) K-tiled accumulator path (resident feats would blow VMEM, e.g. big N on v7x).
    for tm in row_tiles:
        for tk in _POW2_COL:
            if tk > n128:
                continue
            n_pad = _round_up(n, max(tm, tk, 128))
            est = _estimate_vmem(tm, tk, fe_pad, fo_pad, adj_bytes, feat_bytes,
                                 out_bytes, w_bytes, n_pad // tk)
            if est <= budget:
                cands.append(((n_pad, -tm, -tk), (tm, tk, n_pad, est)))
    if cands:
        return min(cands)[1]

    # 3) Last resort (huge feature dims): smallest tiles, let Mosaic try.
    tm, tk = 8, 128
    n_pad = _round_up(n, 128)
    est = _estimate_vmem(tm, tk, fe_pad, fo_pad, adj_bytes, feat_bytes,
                         out_bytes, w_bytes, n_pad // tk)
    return tm, tk, n_pad, est


def _pad2d(a, rows, cols, dtype, ones_col=None):
    """Pad/cast in one fused op, directly in the target dtype; no-op if aligned."""
    a = a.astype(dtype)
    r, c = a.shape
    if r == rows and c == cols and ones_col is None:
        return a
    out = jnp.zeros((rows, cols), dtype).at[:r, :c].set(a)
    if ones_col is not None:
        out = out.at[:, ones_col].set(1)   # degree column rides the MXU matmul
    return out


def _gcn_kernel(*refs, project_in_kernel, spare_col, num_k):
    """One (row-tile i, k-tile k) grid step.

    refs (in order): feats_k, adj, self_rows, [weight], bias, out, [acc], [deg]
      feats_k  : [tk, fe_pad]  aggregation operand (k-tile, or full resident matrix)
      adj      : [tm, tk]      adjacency tile (row tile i, column tile k)
      self_rows: [tm, fe_pad]  this row-tile's own features  (the +I fold)
      weight   : [fe_pad, fo_pad]  (aggregate-first path only)
      bias     : [1, fo_pad]
      out      : [tm, fo_pad]
      acc/deg  : f32 VMEM scratch, only when num_k > 1 (K-tiled reduction)
    """
    it = iter(refs)
    feats_ref = next(it)
    adj_ref = next(it)
    self_ref = next(it)
    w_ref = next(it) if project_in_kernel else None
    b_ref = next(it)
    out_ref = next(it)
    acc_ref = next(it) if num_k > 1 else None
    deg_ref = next(it) if (num_k > 1 and spare_col is None) else None

    adj = adj_ref[...]
    partial = jnp.dot(adj, feats_ref[...], preferred_element_type=jnp.float32)
    if spare_col is None:
        # no spare padded column -> explicit cross-lane rowsum (f32 accumulate)
        pdeg = jnp.sum(adj, axis=1, dtype=jnp.float32, keepdims=True)

    if num_k > 1:
        k = pl.program_id(1)

        @pl.when(k == 0)
        def _init():
            acc_ref[...] = jnp.zeros_like(acc_ref)
            if spare_col is None:
                deg_ref[...] = jnp.zeros_like(deg_ref)

        acc_ref[...] += partial
        if spare_col is None:
            deg_ref[...] += pdeg

    def _finalize():
        agg = acc_ref[...] if num_k > 1 else partial
        agg = agg + self_ref[...].astype(jnp.float32)          # the adj + I fold
        if spare_col is not None:
            deg = agg[:, spare_col:spare_col + 1]              # rowsum(adj) + 1 via ones column
        else:
            deg = (deg_ref[...] if num_k > 1 else pdeg) + 1.0
        inv = 1.0 / deg
        inv = jnp.where(jnp.isnan(inv), 0.0, inv)              # temp[temp != temp] = 0
        norm = agg * inv                                       # diag(d) fold
        if project_in_kernel:
            out = jnp.dot(norm, w_ref[...],
                          preferred_element_type=jnp.float32) + b_ref[...]
        else:
            out = norm + b_ref[...]
        out_ref[...] = out.astype(out_ref.dtype)

    if num_k > 1:
        pl.when(pl.program_id(1) == num_k - 1)(_finalize)
    else:
        _finalize()


def graph_convolution(x, adj, weight, bias=None, *,
                      compute_dtype=jnp.bfloat16,
                      out_dtype=jnp.float32,
                      max_row_tile=1024,
                      _force_tiles=None):
    """GCN forward. x:[N,F_in] adj:[N,N] weight:[F_in,F_out] bias:[F_out]|None -> [N,F_out].

    compute_dtype: dtype of the adjacency and the aggregation-matmul operand.
      Default bf16 (exact for 0/1 adjacency, halves the dominant HBM stream,
      native bf16 MXU with f32 accumulation; the feature side incurs bf16
      rounding).  Pass jnp.float32 for exact f32 parity.  Weights, bias,
      normalization and all accumulation stay f32.
    """
    n, f_in = x.shape
    f_out = weight.shape[1]

    x = x.astype(jnp.float32)
    weight = weight.astype(jnp.float32)

    aggregate_first = f_in <= f_out        # contract the N x N matmul with the smaller dim
    if aggregate_first:
        feats = x                          # aggregate x, project with W inside the kernel
    else:                                  # project once in plain XLA, aggregate in Pallas
        feats = jnp.dot(x, weight, preferred_element_type=jnp.float32)

    fe = feats.shape[1]
    fe_pad = _round_up(fe, 128)            # lane-dense matmul operands
    fo_pad = _round_up(f_out, 128)         # lane-dense output (unmasked vst)
    spare_col = fe if fe < fe_pad else None  # ones column -> degree from the MXU matmul

    adj_bytes = feat_bytes = jnp.dtype(compute_dtype).itemsize
    out_bytes = jnp.dtype(out_dtype).itemsize
    w_bytes = fe_pad * fo_pad * 4 if aggregate_first else 0

    budget, limit_cap = _vmem_budget_and_limit()
    if _force_tiles is not None:           # testing hook: force a specific tiling
        tm, tk = _force_tiles
        n_pad = _round_up(n, max(tm, tk, 128))
        est = _estimate_vmem(tm, tk, fe_pad, fo_pad, adj_bytes, feat_bytes,
                             out_bytes, w_bytes, n_pad // tk)
    else:
        tm, tk, n_pad, est = _select_tiles(n, fe_pad, fo_pad, adj_bytes,
                                           feat_bytes, out_bytes, w_bytes,
                                           budget, max_row_tile)
    num_k = n_pad // tk

    # Padded operands built directly in the compute dtype (single fused pad+cast;
    # no intermediate padded f32 copy of adj).  Padded rows/cols contribute nothing.
    adj_p = _pad2d(adj, n_pad, n_pad, compute_dtype)
    feats_p = _pad2d(feats, n_pad, fe_pad, compute_dtype, ones_col=spare_col)
    if bias is None:
        bias_p = jnp.zeros((1, fo_pad), jnp.float32)
    else:
        bias_p = _pad2d(bias.astype(jnp.float32).reshape(1, f_out), 1, fo_pad,
                        jnp.float32)

    kernel = functools.partial(_gcn_kernel,
                               project_in_kernel=aggregate_first,
                               spare_col=spare_col,
                               num_k=num_k)

    in_specs = [
        pl.BlockSpec((tk, fe_pad), lambda i, k: (k, 0)),   # aggregation operand
        pl.BlockSpec((tm, tk), lambda i, k: (i, k)),       # adjacency tile
        pl.BlockSpec((tm, fe_pad), lambda i, k: (i, 0)),   # self rows (+I fold)
    ]
    args = [feats_p, adj_p, feats_p]
    if aggregate_first:
        w_p = _pad2d(weight, fe_pad, fo_pad, jnp.float32)  # zero row kills the deg column
        in_specs.append(pl.BlockSpec((fe_pad, fo_pad), lambda i, k: (0, 0)))
        args.append(w_p)
    in_specs.append(pl.BlockSpec((1, fo_pad), lambda i, k: (0, 0)))
    args.append(bias_p)

    scratch = []
    if num_k > 1:
        scratch.append(pltpu.VMEM((tm, fe_pad), jnp.float32))
        if spare_col is None:
            scratch.append(pltpu.VMEM((tm, 1), jnp.float32))

    vmem_limit = int(min(limit_cap, max(32 * 1024 * 1024, (est * 5) // 4)))

    out_p = pl.pallas_call(
        kernel,
        out_shape=jax.ShapeDtypeStruct((n_pad, fo_pad), out_dtype),
        grid=(n_pad // tm, num_k),
        in_specs=in_specs,
        out_specs=pl.BlockSpec((tm, fo_pad), lambda i, k: (i, 0)),
        scratch_shapes=scratch,
        compiler_params=pltpu.CompilerParams(
            dimension_semantics=("parallel", "arbitrary"),
            vmem_limit_bytes=vmem_limit),
    )(*args)

    if n_pad != n or fo_pad != f_out:
        out_p = out_p[:n, :f_out]
    return out_p


if __name__ == "__main__":
    key = jax.random.PRNGKey(0)

    def make_layer(k, f_in, f_out):
        kw, kb = jax.random.split(k)
        stdv = 1.0 / math.sqrt(f_out)            # matches reset_parameters()
        w = jax.random.uniform(kw, (f_in, f_out), minval=-stdv, maxval=stdv,
                               dtype=jnp.float32)
        b = jax.random.uniform(kb, (f_out,), minval=-stdv, maxval=stdv,
                               dtype=jnp.float32)
        return w, b

    def reference(x, adj, w, b):
        n = adj.shape[0]
        a = adj + jnp.eye(n, dtype=jnp.float32)
        temp = 1.0 / jnp.sum(a, axis=1)
        temp = jnp.where(jnp.isnan(temp), 0.0, temp)
        out = jnp.diag(temp) @ a @ (x @ w)
        return out + b if b is not None else out

    def check(out, ref, atol, rtol, name):
        out = jax.block_until_ready(out)
        assert jnp.allclose(out, ref, atol=atol, rtol=rtol), \
            f"mismatch vs reference ({name})"

    k_x, k_adj, k_l1, k_l2, k_x3, k_adj3, k_l3, k_l4 = jax.random.split(key, 8)

    # --- small graph, N=16 ----------------------------------------------------
    N = 16
    adj = (jax.random.uniform(k_adj, (N, N)) > 0.7).astype(jnp.float32)

    # 1) f_in(8) < f_out(32): aggregate-then-project path, exact f32 compute.
    x1 = jax.random.normal(k_x, (N, 8), dtype=jnp.float32)
    w1, b1 = make_layer(k_l1, 8, 32)
    check(graph_convolution(x1, adj, w1, b1, compute_dtype=jnp.float32),
          reference(x1, adj, w1, b1), 2e-5, 2e-5, "aggregate-first, f32")

    # 2) f_out(8) < f_in(32): project-then-aggregate path, no bias, exact f32.
    x2 = jax.random.normal(k_x, (N, 32), dtype=jnp.float32)
    w2, _ = make_layer(k_l2, 32, 8)
    check(graph_convolution(x2, adj, w2, None, compute_dtype=jnp.float32),
          reference(x2, adj, w2, None), 2e-5, 2e-5, "project-first, f32, no bias")

    # 3) Default bf16 compute (exact 0/1 adjacency; features rounded to bf16).
    check(graph_convolution(x1, adj, w1, b1),
          reference(x1, adj, w1, b1), 5e-2, 5e-2, "aggregate-first, bf16 default")

    # --- larger graph, N=300, forced small tiles: exercises the K-tiled
    # accumulator path (multi-step reduction axis) of both kernel variants. ----
    N2 = 300
    adj3 = (jax.random.uniform(k_adj3, (N2, N2)) > 0.7).astype(jnp.float32)

    # 4) aggregate-first, K-tiled, degree via the spare "ones" column.
    x3 = jax.random.normal(k_x3, (N2, 8), dtype=jnp.float32)
    w3, b3 = make_layer(k_l3, 8, 32)
    check(graph_convolution(x3, adj3, w3, b3, compute_dtype=jnp.float32,
                            _force_tiles=(128, 128)),
          reference(x3, adj3, w3, b3), 1e-4, 1e-4, "aggregate-first, K-tiled")

    # 5) project-first, K-tiled, no spare column (f_out == 128): degree via the
    #    jnp.sum fallback accumulated in the dedicated degree scratch.
    x4 = jax.random.normal(k_x3, (N2, 192), dtype=jnp.float32)
    w4, b4 = make_layer(k_l4, 192, 128)
    check(graph_convolution(x4, adj3, w4, b4, compute_dtype=jnp.float32,
                            _force_tiles=(128, 128)),
          reference(x4, adj3, w4, b4), 1e-4, 1e-4, "project-first, K-tiled, no spare")

    print("KERNEL_OK")
</pallas_src>

<mosaic_0001>
module attributes {stable_mosaic.version = 11 : i64} {
  func.func @_gcn_kernel(%arg0: i32, %arg1: i32, %arg2: memref<128x128xf32, #tpu.memory_space<vmem>>, %arg3: memref<128x128xf32, #tpu.memory_space<vmem>>, %arg4: memref<128x128xf32, #tpu.memory_space<vmem>>, %arg5: memref<128x128xf32, #tpu.memory_space<vmem>>, %arg6: memref<1x128xf32, #tpu.memory_space<vmem>>, %arg7: memref<128x128xf32, #tpu.memory_space<vmem>>) attributes {dimension_semantics = [#tpu.dimension_semantics<parallel>, #tpu.dimension_semantics<arbitrary>], iteration_bounds = array<i64: 1, 1>, scalar_prefetch = 0 : i64, scratch_operands = 0 : i64, tpu.core_type = #tpu.core_type<tc>, window_params = [{transform_indices = @transform_0, window_bounds = array<i64: 128, 128>}, {transform_indices = @transform_1, window_bounds = array<i64: 128, 128>}, {transform_indices = @transform_2, window_bounds = array<i64: 128, 128>}, {pipeline_mode = #tpu.pipeline_mode<synchronous>, transform_indices = @transform_3, window_bounds = array<i64: 128, 128>}, {pipeline_mode = #tpu.pipeline_mode<synchronous>, transform_indices = @transform_4, window_bounds = array<i64: 1, 128>}, {transform_indices = @transform_5, window_bounds = array<i64: 128, 128>}]} {
    %c0 = arith.constant 0 : index
    %c0_0 = arith.constant 0 : index
    %0 = vector.load %arg3[%c0, %c0_0] : memref<128x128xf32, #tpu.memory_space<vmem>>, vector<128x128xf32>
    %c0_1 = arith.constant 0 : index
    %c0_2 = arith.constant 0 : index
    %1 = vector.load %arg2[%c0_1, %c0_2] : memref<128x128xf32, #tpu.memory_space<vmem>>, vector<128x128xf32>
    %cst = arith.constant dense<0.000000e+00> : vector<128x128xf32>
    %2 = tpu.matmul %0, %1, %cst {dimension_numbers = #tpu.dot_dimension_numbers<[1], [0], [0], [1], [0, 0, 1, 1], [], []>} : vector<128x128xf32>, vector<128x128xf32>, vector<128x128xf32> -> vector<128x128xf32>
    %c0_3 = arith.constant 0 : index
    %c0_4 = arith.constant 0 : index
    %3 = vector.load %arg4[%c0_3, %c0_4] : memref<128x128xf32, #tpu.memory_space<vmem>>, vector<128x128xf32>
    %4 = arith.addf %2, %3 : vector<128x128xf32>
    %5 = vector.extract_strided_slice %4 {offsets = [0, 8], sizes = [128, 1], strides = [1, 1]} : vector<128x128xf32> to vector<128x1xf32>
    %cst_5 = arith.constant 1.000000e+00 : f32
    %6 = vector.broadcast %cst_5 : f32 to vector<128x1xf32>
    %7 = arith.divf %6, %5 : vector<128x1xf32>
    %8 = arith.cmpf one, %7, %7 : vector<128x1xf32>
    %cst_6 = arith.constant 0.000000e+00 : f32
    %9 = vector.broadcast %cst_6 : f32 to vector<128x1xf32>
    %10 = arith.select %8, %9, %7 : vector<128x1xi1>, vector<128x1xf32>
    %11 = vector.broadcast %10 : vector<128x1xf32> to vector<128x128xf32>
    %12 = arith.mulf %4, %11 : vector<128x128xf32>
    %c0_7 = arith.constant 0 : index
    %c0_8 = arith.constant 0 : index
    %13 = vector.load %arg5[%c0_7, %c0_8] : memref<128x128xf32, #tpu.memory_space<vmem>>, vector<128x128xf32>
    %cst_9 = arith.constant dense<0.000000e+00> : vector<128x128xf32>
    %14 = tpu.matmul %12, %13, %cst_9 {dimension_numbers = #tpu.dot_dimension_numbers<[1], [0], [0], [1], [0, 0, 1, 1], [], []>} : vector<128x128xf32>, vector<128x128xf32>, vector<128x128xf32> -> vector<128x128xf32>
    %c0_10 = arith.constant 0 : index
    %c0_11 = arith.constant 0 : index
    %15 = vector.load %arg6[%c0_10, %c0_11] : memref<1x128xf32, #tpu.memory_space<vmem>>, vector<1x128xf32>
    %16 = vector.broadcast %15 : vector<1x128xf32> to vector<128x128xf32>
    %17 = arith.addf %14, %16 : vector<128x128xf32>
    %c0_12 = arith.constant 0 : index
    %c0_13 = arith.constant 0 : index
    %18 = vector.load %arg7[%c0_12, %c0_13] : memref<128x128xf32, #tpu.memory_space<vmem>>, vector<128x128xf32>
    tpu.vector_store %arg7[%c0_12, %c0_13], %17 {strides = array<i32>} : memref<128x128xf32, #tpu.memory_space<vmem>>, vector<128x128xf32>,
    return
  }
  func.func @transform_0(%arg0: i32, %arg1: i32) -> (i32, i32) {
    %c0_i32 = arith.constant 0 : i32
    %c0_i32_0 = arith.constant 0 : i32
    return %arg1, %c0_i32 : i32, i32
  }
  func.func @transform_1(%arg0: i32, %arg1: i32) -> (i32, i32) {
    %c0_i32 = arith.constant 0 : i32
    return %arg0, %arg1 : i32, i32
  }
  func.func @transform_2(%arg0: i32, %arg1: i32) -> (i32, i32) {
    %c0_i32 = arith.constant 0 : i32
    %c0_i32_0 = arith.constant 0 : i32
    return %arg0, %c0_i32 : i32, i32
  }
  func.func @transform_3(%arg0: i32, %arg1: i32) -> (i32, i32) {
    %c0_i32 = arith.constant 0 : i32
    %c0_i32_0 = arith.constant 0 : i32
    %c0_i32_1 = arith.constant 0 : i32
    return %c0_i32, %c0_i32_0 : i32, i32
  }
  func.func @transform_4(%arg0: i32, %arg1: i32) -> (i32, i32) {
    %c0_i32 = arith.constant 0 : i32
    %c0_i32_0 = arith.constant 0 : i32
    %c0_i32_1 = arith.constant 0 : i32
    return %c0_i32, %c0_i32_0 : i32, i32
  }
  func.func @transform_5(%arg0: i32, %arg1: i32) -> (i32, i32) {
    %c0_i32 = arith.constant 0 : i32
    %c0_i32_0 = arith.constant 0 : i32
    return %arg0, %c0_i32 : i32, i32
  }
}

</mosaic_0001>

<bundles_post_ra>
// kernel: tpu_custom_call.1
= control target key start
LH: loop header
LB: loop body
LE: loop exit
PB: predicated region body
PF: predicated region fallthrough
CT: control target
= control target key end

     0   :  { %10 = vsyncpa [#allocation3], 0  ;;  %s1227_s0 = inlined_call_operand.hbm [shape: f32[128,128], index: 0, kind: input, shape index: {}]   ;;  %s1228_s1 = inlined_call_operand.hbm [shape: f32[128,128], index: 1, kind: input, shape index: {}]   ;;  %s1229_s2 = inlined_call_operand.hbm [shape: f32[128,128], index: 2, kind: input, shape index: {}]   ;;  %s1230_s3 = inlined_call_operand.hbm [shape: f32[128,128], index: 3, kind: input, shape index: {}]   ;;  %s1231_s4 = inlined_call_operand.vmem [shape: f32[1,128], index: 4, kind: input, shape index: {}]   ;;  %s1232_s5 = inlined_call_operand.hbm [shape: f32[128,128], index: 5, kind: output, shape index: {}]  }
   0x1   :  { %11 = vsyncpa [#allocation6], 0 }
   0x2   :  { %12 = vsyncpa [#allocation9], 0 }
   0x3   :  { %13 = vsyncpa [#allocation4], 0  ;;  %s1033_s18 = smov [#allocation5]   ;;  %s1034_s20 = smov [#allocation2]  }
   0x4   :  { %s31_s19 = sshll.u32 %s1033_s18, 4  ;;  %s19_s21 = sshll.u32 %s1034_s20, 4  ;;  %s32_s19 = int_to_ptr.vmem [resolvable:$true] %s31_s19  ;;  %s1071_s21 = int_to_ptr.vmem [resolvable:$true] %s19_s21 }
   0x5   :  { %s915_s24 = scalar_lea.hbm %s1228_s1, 2048 }
   0x6   :  { %p916_p0 = scmp.ne.s32.totalorder %s1228_s1, %s915_s24  ;;  %p919_p1 = scmp.lt.u32.totalorder %s915_s24, %s1228_s1 }
   0x8   :  { %p921_p2 = pnand %p919_p1, %p916_p0 }
   0xa   :  { %924 = shalt.err (!%p921_p2)
}
   0xb   :  { %s925_s29 = scalar_lea.vmem %s32_s19, 2048  ;;  %p930_p4 = scmp.lt.s32.totalorder %s32_s19, %s32_s19 }
   0xc   :  { %p926_p3 = scmp.ne.s32.totalorder %s32_s19, %s925_s29  ;;  %p931_p5 = scmp.lt.s32.totalorder %s925_s29, %s925_s29 }
   0xe   :  { %p932_p6 = por %p931_p5, %p930_p4 }
  0x10   :  { %p933_p7 = pnand %p932_p6, %p926_p3 }
  0x12   :  { %936 = shalt.err (!%p933_p7)
}
  0x13   :  { %s1035_s30 = smov 128   ;;  %s1036_s6 = smov 8  }
  0x14   :  { %37 = dma.hbm_to_vmem [thread:$0]  %s1228_s1, 2048, %s32_s19, [#allocation6], %s1035_s30, %s1035_s30, %s1036_s6  }
  0x15   :  { %s937_s11 = scalar_lea.hbm %s1227_s0, 2048 }
  0x16   :  { %p938_p8 = scmp.ne.s32.totalorder %s1227_s0, %s937_s11  ;;  %p941_p9 = scmp.lt.u32.totalorder %s937_s11, %s1227_s0 }
  0x18   :  { %p943_p10 = pnand %p941_p9, %p938_p8 }
  0x1a   :  { %946 = shalt.err (!%p943_p10)
}
  0x1b   :  { %s947_s16 = scalar_lea.vmem %s1071_s21, 2048  ;;  %p952_p12 = scmp.lt.s32.totalorder %s1071_s21, %s1071_s21 }
  0x1c   :  { %p948_p11 = scmp.ne.s32.totalorder %s1071_s21, %s947_s16  ;;  %p953_p13 = scmp.lt.s32.totalorder %s947_s16, %s947_s16 }
  0x1e   :  { %p954_p0 = por %p953_p13, %p952_p12 }
  0x20   :  { %p955_p1 = pnand %p954_p0, %p948_p11 }
  0x22   :  { %958 = shalt.err (!%p955_p1)
}
  0x23   :  { %25 = dma.hbm_to_vmem [thread:$0]  %s1227_s0, 2048, %s1071_s21, [#allocation3], %s1035_s30, %s1035_s30, %s1036_s6  }
  0x24   :  { %s1037_s18 = smov [#allocation7]   ;;  %s1038_s20 = smov [#allocation8]  }
  0x25   :  { %s43_s19 = sshll.u32 %s1037_s18, 4  ;;  %s55_s22 = sshll.u32 %s1038_s20, 4  ;;  %s44_s19 = int_to_ptr.vmem [resolvable:$true] %s43_s19  ;;  %s1108_s22 = int_to_ptr.vmem [resolvable:$true] %s55_s22 }
  0x26   :  { %s959_s25 = scalar_lea.hbm %s1229_s2, 2048 }
  0x27   :  { %p960_p2 = scmp.ne.s32.totalorder %s1229_s2, %s959_s25  ;;  %p963_p3 = scmp.lt.u32.totalorder %s959_s25, %s1229_s2 }
  0x29   :  { %p965_p4 = pnand %p963_p3, %p960_p2 }
  0x2b   :  { %968 = shalt.err (!%p965_p4)
}
  0x2c   :  { %s969_s0 = scalar_lea.vmem %s44_s19, 2048  ;;  %p974_p6 = scmp.lt.s32.totalorder %s44_s19, %s44_s19 }
  0x2d   :  { %p970_p5 = scmp.ne.s32.totalorder %s44_s19, %s969_s0  ;;  %p975_p7 = scmp.lt.s32.totalorder %s969_s0, %s969_s0 }
  0x2f   :  { %p976_p8 = por %p975_p7, %p974_p6 }
  0x31   :  { %p977_p9 = pnand %p976_p8, %p970_p5 }
  0x33   :  { %980 = shalt.err (!%p977_p9)
}
  0x34   :  { %49 = dma.hbm_to_vmem [thread:$0]  %s1229_s2, 2048, %s44_s19, [#allocation6], %s1035_s30, %s1035_s30, %s1036_s6  }
  0x35   :  { %s981_s10 = scalar_lea.hbm %s1230_s3, 2048 }
  0x36   :  { %p982_p10 = scmp.ne.s32.totalorder %s1230_s3, %s981_s10  ;;  %p985_p11 = scmp.lt.u32.totalorder %s981_s10, %s1230_s3 }
  0x38   :  { %p987_p12 = pnand %p985_p11, %p982_p10 }
  0x3a   :  { %990 = shalt.err (!%p987_p12)
}
  0x3b   :  { %s991_s15 = scalar_lea.vmem %s1108_s22, 2048  ;;  %p996_p0 = scmp.lt.s32.totalorder %s1108_s22, %s1108_s22 }
  0x3c   :  { %p992_p13 = scmp.ne.s32.totalorder %s1108_s22, %s991_s15  ;;  %p997_p1 = scmp.lt.s32.totalorder %s991_s15, %s991_s15 }
  0x3e   :  { %p998_p2 = por %p997_p1, %p996_p0 }
  0x40   :  { %p999_p3 = pnand %p998_p2, %p992_p13 }
  0x42   :  { %1002 = shalt.err (!%p999_p3)
}
  0x43   :  { %61 = dma.hbm_to_vmem [thread:$0]  %s1230_s3, 2048, %s1108_s22, [#allocation9], %s1035_s30, %s1035_s30, %s1036_s6  }
  0x44   :  { %1025 = dma.done.wait [#allocation3], 2048  }
  0x45   :  { %1026 = vsyncadd [#allocation3], 4294965248 }
  0x46   :  { %1027 = dma.done.wait [#allocation6], 4096  }
  0x47   :  { %1028 = vsyncadd [#allocation6], 4294963200 }
  0x48   :  { %1029 = dma.done.wait [#allocation9], 2048  }
  0x49   :  { %1030 = vsyncadd [#allocation9], 4294965248  ;;  %v92_v0 = vld [vmem:[#allocation2] sm:$0xff]  ;;  %v93_v1 = vld [vmem:[#allocation2 + $0x8] sm:$0xff]  ;;  %v1039_v40 = vmov 8  }
  0x4a   :  { %v94_v2 = vld [vmem:[#allocation2 + $0x10] sm:$0xff]  ;;  %v809_v3 = vpack.c.bf16 %v93_v1, %v92_v0  ;;  %v95_v4 = vld [vmem:[#allocation2 + $0x18] sm:$0xff]  ;;  %v96_v6 = vld [vmem:[#allocation2 + $0x20] sm:$0xff]  ;;  %881 = vset.pattern.permute.xlu0 %v1039_v40  ;;  %882 = vset.pattern.permute.xlu1 %v1039_v40 }
  0x4b   :  { %v813_v5 = vpack.c.bf16 %v95_v4, %v94_v2  ;;  %v97_v7 = vld [vmem:[#allocation2 + $0x28] sm:$0xff]  ;;  %v76_v9 = vld [vmem:[#allocation5] sm:$0xff]  ;;  %v98_v10 = vld [vmem:[#allocation2 + $0x30] sm:$0xff] }
  0x4c   :  { %810 = vmatprep.subr.bf16.mxu0 %v809_v3  ;;  %v817_v8 = vpack.c.bf16 %v97_v7, %v96_v6  ;;  %v99_v11 = vld [vmem:[#allocation2 + $0x38] sm:$0xff]  ;;  %729 = vmatprep.mubr.f32.mxu0 %v76_v9  ;;  %v100_v13 = vld [vmem:[#allocation2 + $0x40] sm:$0xff]  ;;  %v101_v14 = vld [vmem:[#allocation2 + $0x48] sm:$0xff] }
  0x4d   :  { %812 = vmatpush3.bf16.msra.mxu0 %v809_v3  ;;  %v821_v12 = vpack.c.bf16 %v99_v11, %v98_v10  ;;  %v825_v15 = vpack.c.bf16 %v101_v14, %v100_v13  ;;  %v102_v16 = vld [vmem:[#allocation2 + $0x50] sm:$0xff]  ;;  %v103_v17 = vld [vmem:[#allocation2 + $0x58] sm:$0xff]  ;;  %v104_v19 = vld [vmem:[#allocation2 + $0x60] sm:$0xff] }
  0x4e   :  { %814 = vmatprep.subr.bf16.mxu0 %v813_v5  ;;  %v829_v18 = vpack.c.bf16 %v103_v17, %v102_v16  ;;  %v105_v20 = vld [vmem:[#allocation2 + $0x68] sm:$0xff]  ;;  %v106_v22 = vld [vmem:[#allocation2 + $0x70] sm:$0xff]  ;;  %v107_v23 = vld [vmem:[#allocation2 + $0x78] sm:$0xff] }
  0x4f   :  { %v833_v21 = vpack.c.bf16 %v105_v20, %v104_v19  ;;  %v837_v24 = vpack.c.bf16 %v107_v23, %v106_v22  ;;  %v77_v25 = vld [vmem:[#allocation5 + $0x8] sm:$0xff]  ;;  %v78_v26 = vld [vmem:[#allocation5 + $0x10] sm:$0xff]  ;;  %v79_v27 = vld [vmem:[#allocation5 + $0x18] sm:$0xff] }
  0x50   :  { %v80_v28 = vld [vmem:[#allocation5 + $0x20] sm:$0xff]  ;;  %v81_v29 = vld [vmem:[#allocation5 + $0x28] sm:$0xff]  ;;  %v82_v30 = vld [vmem:[#allocation5 + $0x30] sm:$0xff] }
  0x51   :  { %816 = vmatpush3.bf16.msra.mxu0 %v813_v5  ;;  %v83_v31 = vld [vmem:[#allocation5 + $0x38] sm:$0xff]  ;;  %v84_v32 = vld [vmem:[#allocation5 + $0x40] sm:$0xff]  ;;  %v85_v33 = vld [vmem:[#allocation5 + $0x48] sm:$0xff] }
  0x52   :  { %818 = vmatprep.subr.bf16.mxu0 %v817_v8  ;;  %v86_v34 = vld [vmem:[#allocation5 + $0x50] sm:$0xff]  ;;  %v87_v35 = vld [vmem:[#allocation5 + $0x58] sm:$0xff]  ;;  %v88_v36 = vld [vmem:[#allocation5 + $0x60] sm:$0xff] }
  0x53   :  { %v89_v37 = vld [vmem:[#allocation5 + $0x68] sm:$0xff]  ;;  %v90_v38 = vld [vmem:[#allocation5 + $0x70] sm:$0xff]  ;;  %v91_v39 = vld [vmem:[#allocation5 + $0x78] sm:$0xff] }
  0x54   :  { %v429_v41 = vld [vmem:[#allocation8] sm:$0xff]  ;;  %v430_v42 = vld [vmem:[#allocation8 + $0x8] sm:$0xff]  ;;  %v431_v43 = vld [vmem:[#allocation8 + $0x10] sm:$0xff] }
  0x55   :  { %820 = vmatpush3.bf16.msra.mxu0 %v817_v8  ;;  %v841_v44 = vpack.c.bf16 %v430_v42, %v429_v41  ;;  %v432_v45 = vld [vmem:[#allocation8 + $0x18] sm:$0xff]  ;;  %v433_v47 = vld [vmem:[#allocation8 + $0x20] sm:$0xff]  ;;  %v434_v48 = vld [vmem:[#allocation8 + $0x28] sm:$0xff] }
  0x56   :  { %822 = vmatprep.subr.bf16.mxu0 %v821_v12  ;;  %v845_v46 = vpack.c.bf16 %v432_v45, %v431_v43  ;;  %v849_v49 = vpack.c.bf16 %v434_v48, %v433_v47  ;;  %v435_v50 = vld [vmem:[#allocation8 + $0x30] sm:$0xff]  ;;  %v436_v51 = vld [vmem:[#allocation8 + $0x38] sm:$0xff]  ;;  %v437_v53 = vld [vmem:[#allocation8 + $0x40] sm:$0xff] }
  0x57   :  { %842 = vmatprep.subr.bf16.mxu1 %v841_v44  ;;  %v853_v52 = vpack.c.bf16 %v436_v51, %v435_v50  ;;  %v438_v54 = vld [vmem:[#allocation8 + $0x48] sm:$0xff]  ;;  %v439_v56 = vld [vmem:[#allocation8 + $0x50] sm:$0xff]  ;;  %v440_v57 = vld [vmem:[#allocation8 + $0x58] sm:$0xff] }
  0x58   :  { %844 = vmatpush3.bf16.msra.mxu1 %v841_v44  ;;  %v857_v55 = vpack.c.bf16 %v438_v54, %v437_v53  ;;  %v861_v58 = vpack.c.bf16 %v440_v57, %v439_v56  ;;  %v441_v59 = vld [vmem:[#allocation8 + $0x60] sm:$0xff]  ;;  %v442_v60 = vld [vmem:[#allocation8 + $0x68] sm:$0xff]  ;;  %v111_v4 = vld [vmem:[#allocation7 + $0x18] sm:$0xff] }
  0x59   :  { %824 = vmatpush3.bf16.msra.mxu0 %v821_v12  ;;  %846 = vmatprep.subr.bf16.mxu1 %v845_v46  ;;  %v865_v61 = vpack.c.bf16 %v442_v60, %v441_v59  ;;  %v109_v62 = vld [vmem:[#allocation7 + $0x8] sm:$0xff]  ;;  %v108_v63 = vld [vmem:[#allocation7] sm:$0xff]  ;;  %v110_v5 = vld [vmem:[#allocation7 + $0x10] sm:$0xff] }
  0x5a   :  { %826 = vmatprep.subr.bf16.mxu0 %v825_v15  ;;  %v113_v10 = vld [vmem:[#allocation7 + $0x28] sm:$0xff]  ;;  %v112_v11 = vld [vmem:[#allocation7 + $0x20] sm:$0xff]  ;;  %v115_v16 = vld [vmem:[#allocation7 + $0x38] sm:$0xff] }
  0x5b   :  { %v114_v17 = vld [vmem:[#allocation7 + $0x30] sm:$0xff]  ;;  %v120_v47 = vld [vmem:[#allocation7 + $0x60] sm:$0xff]  ;;  %v123_v56 = vld [vmem:[#allocation7 + $0x78] sm:$0xff] }
  0x5c   :  { %848 = vmatpush3.bf16.msra.mxu1 %v845_v46  ;;  %v121_v46 = vld [vmem:[#allocation7 + $0x68] sm:$0xff]  ;;  %v122_v57 = vld [vmem:[#allocation7 + $0x70] sm:$0xff] }
  0x5d   :  { %828 = vmatpush3.bf16.msra.mxu0 %v825_v15  ;;  %850 = vmatprep.subr.bf16.mxu1 %v849_v49 }
  0x5e   :  { %830 = vmatprep.subr.bf16.mxu0 %v829_v18 }
  0x60   :  { %852 = vmatpush3.bf16.msra.mxu1 %v849_v49 }
  0x61   :  { %832 = vmatpush3.bf16.msra.mxu0 %v829_v18  ;;  %854 = vmatprep.subr.bf16.mxu1 %v853_v52 }
  0x62   :  { %834 = vmatprep.subr.bf16.mxu0 %v833_v21 }
  0x64   :  { %856 = vmatpush3.bf16.msra.mxu1 %v853_v52 }
  0x65   :  { %836 = vmatpush3.bf16.msra.mxu0 %v833_v21  ;;  %858 = vmatprep.subr.bf16.mxu1 %v857_v55 }
  0x66   :  { %838 = vmatprep.subr.bf16.mxu0 %v837_v24 }
  0x68   :  { %860 = vmatpush3.bf16.msra.mxu1 %v857_v55 }
  0x69   :  { %840 = vmatpush3.bf16.msra.mxu0 %v837_v24  ;;  %862 = vmatprep.subr.bf16.mxu1 %v861_v58  ;;  %v117_v24 = vld [vmem:[#allocation7 + $0x48] sm:$0xff] }
  0x6c   :  { %730 = vmatmul.mubr.f32.vlgmr.msra.gmra.mrb[0].mxu0 %v77_v25  ;;  %864 = vmatpush3.bf16.msra.mxu1 %v861_v58  ;;  %v116_v25 = vld [vmem:[#allocation7 + $0x40] sm:$0xff] }
  0x6d   :  { %732 = vmatprep.mubr.f32.mxu0 %v78_v26  ;;  %866 = vmatprep.subr.bf16.mxu1 %v865_v61 }
  0x70   :  { %733 = vmatmul.mubr.f32.gmra.mrb[2].mxu0 %v79_v27  ;;  %868 = vmatpush3.bf16.msra.mxu1 %v865_v61 }
  0x71   :  { %735 = vmatprep.mubr.f32.mxu0 %v80_v28  ;;  %v443_v28 = vld [vmem:[#allocation8 + $0x70] sm:$0xff] }
  0x74   :  { %736 = vmatmul.mubr.f32.gmra.mrb[4].mxu0 %v81_v29  ;;  %v444_v29 = vld [vmem:[#allocation8 + $0x78] sm:$0xff] }
  0x75   :  { %738 = vmatprep.mubr.f32.mxu0 %v82_v30 }
  0x78   :  { %739 = vmatmul.mubr.f32.gmra.mrb[6].mxu0 %v83_v31 }
  0x79   :  { %741 = vmatprep.mubr.f32.mxu0 %v84_v32 }
  0x7c   :  { %742 = vmatmul.mubr.f32.gmra.mrb[8].mxu0 %v85_v33  ;;  %v869_v33 = vpack.c.bf16 %v444_v29, %v443_v28 }
  0x7d   :  { %744 = vmatprep.mubr.f32.mxu0 %v86_v34 }
  0x7e   :  { %870 = vmatprep.subr.bf16.mxu1 %v869_v33 }
  0x7f   :  { %872 = vmatpush3.bf16.msra.mxu1 %v869_v33 }
  0x80   :  { %745 = vmatmul.mubr.f32.gmra.mrb[10].mxu0 %v87_v35 }
  0x81   :  { %747 = vmatprep.mubr.f32.mxu0 %v88_v36  ;;  %v119_v36 = vld [vmem:[#allocation7 + $0x58] sm:$0xff] }
  0x84   :  { %748 = vmatmul.mubr.f32.gmra.mrb[12].mxu0 %v89_v37  ;;  %v118_v37 = vld [vmem:[#allocation7 + $0x50] sm:$0xff] }
  0x85   :  { %750 = vmatprep.mubr.f32.mxu0 %v90_v38 }
  0x88   :  { %751 = vmatmul.mubr.f32.gmra.mrb[14].mxu0 %v91_v39 }
 0x13f   :  { %v731_v0 = vpop.f32.mrb[0].mxu0 }
 0x140   :  { %v1145_v1 = vadd.f32 %v731_v0, %v109_v62  ;;  %v190_v2 = vpop.f32.mrb[1].mxu0 }
 0x141   :  { %v1147_v3 = vadd.f32 %v190_v2, %v108_v63 }
 0x142   :  { %883 = vrcp.f32 %v1145_v1 }
 0x143   :  { %885 = vrcp.f32 %v1147_v3  ;;  %v734_v6 = vpop.f32.mrb[2].mxu0 }
 0x144   :  { %v1151_v7 = vadd.f32 %v734_v6, %v111_v4  ;;  %v200_v8 = vpop.f32.mrb[3].mxu0 }
 0x145   :  { %v1153_v9 = vadd.f32 %v200_v8, %v110_v5 }
 0x146   :  { %887 = vrcp.f32 %v1151_v7 }
 0x147   :  { %889 = vrcp.f32 %v1153_v9  ;;  %v737_v12 = vpop.f32.mrb[4].mxu0 }
 0x148   :  { %v1157_v13 = vadd.f32 %v737_v12, %v113_v10  ;;  %v210_v14 = vpop.f32.mrb[5].mxu0 }
 0x149   :  { %v1159_v15 = vadd.f32 %v210_v14, %v112_v11 }
 0x14a   :  { %891 = vrcp.f32 %v1157_v13 }
 0x14b   :  { %893 = vrcp.f32 %v1159_v15  ;;  %v740_v18 = vpop.f32.mrb[6].mxu0 }
 0x14c   :  { %v884_v19 = vpop.eup %883  ;;  %v1163_v20 = vadd.f32 %v740_v18, %v115_v16  ;;  %v220_v21 = vpop.f32.mrb[7].mxu0 }
 0x14d   :  { %v886_v22 = vpop.eup %885  ;;  %v1165_v23 = vadd.f32 %v220_v21, %v114_v17  ;;  %vm302_vm1 = vcmp.ne.f32.partialorder %v884_v19, %v884_v19 }
 0x14e   :  { %895 = vrcp.f32 %v1163_v20  ;;  %vm301_vm0 = vcmp.ne.f32.partialorder %v886_v22, %v886_v22  ;;  %v318_v40 = vsel %vm302_vm1, 0.0, %v884_v19 }
 0x14f   :  { %897 = vrcp.f32 %v1165_v23  ;;  %v743_v26 = vpop.f32.mrb[8].mxu0  ;;  %v317_v27 = vsel %vm301_vm0, 0.0, %v886_v22 }
 0x150   :  { %v888_v30 = vpop.eup %887  ;;  %v1169_v31 = vadd.f32 %v743_v26, %v117_v24  ;;  %v230_v32 = vpop.f32.mrb[9].mxu0  ;;  %335 = vperm.xlu0 %881, %v317_v27  }
 0x151   :  { %v890_v34 = vpop.eup %889  ;;  %v1171_v35 = vadd.f32 %v230_v32, %v116_v25  ;;  %vm304_vm3 = vcmp.ne.f32.partialorder %v888_v30, %v888_v30 }
 0x152   :  { %899 = vrcp.f32 %v1169_v31  ;;  %vm303_vm2 = vcmp.ne.f32.partialorder %v890_v34, %v890_v34  ;;  %v320_v49 = vsel %vm304_vm3, 0.0, %v888_v30 }
 0x153   :  { %901 = vrcp.f32 %v1171_v35  ;;  %v746_v38 = vpop.f32.mrb[10].mxu0  ;;  %v319_v39 = vsel %vm303_vm2, 0.0, %v890_v34 }
 0x154   :  { %v892_v41 = vpop.eup %891  ;;  %v1175_v42 = vadd.f32 %v746_v38, %v119_v36  ;;  %v240_v43 = vpop.f32.mrb[11].mxu0  ;;  %345 = vperm.xlu1 %882, %v319_v39   ;;  %340 = vperm.xlu0 %881, %v318_v40  }
 0x155   :  { %v894_v44 = vpop.eup %893  ;;  %v1177_v45 = vadd.f32 %v240_v43, %v118_v37  ;;  %vm306_vm5 = vcmp.ne.f32.partialorder %v892_v41, %v892_v41 }
 0x156   :  { %903 = vrcp.f32 %v1175_v42  ;;  %vm305_vm4 = vcmp.ne.f32.partialorder %v894_v44, %v894_v44  ;;  %v322_v59 = vsel %vm306_vm5, 0.0, %v892_v41 }
 0x157   :  { %905 = vrcp.f32 %v1177_v45  ;;  %v749_v48 = vpop.f32.mrb[12].mxu0  ;;  %v321_v50 = vsel %vm305_vm4, 0.0, %v894_v44 }
 0x158   :  { %v896_v51 = vpop.eup %895  ;;  %v1181_v52 = vadd.f32 %v749_v48, %v121_v46  ;;  %v250_v53 = vpop.f32.mrb[13].mxu0  ;;  %350 = vperm.xlu1 %882, %v320_v49   ;;  %355 = vperm.xlu0 %881, %v321_v50  }
 0x159   :  { %v898_v54 = vpop.eup %897  ;;  %v1183_v55 = vadd.f32 %v250_v53, %v120_v47  ;;  %vm308_vm7 = vcmp.ne.f32.partialorder %v896_v51, %v896_v51 }
 0x15a   :  { %907 = vrcp.f32 %v1181_v52  ;;  %vm307_vm6 = vcmp.ne.f32.partialorder %v898_v54, %v898_v54  ;;  %v324_v4 = vsel %vm308_vm7, 0.0, %v896_v51 }
 0x15b   :  { %909 = vrcp.f32 %v1183_v55  ;;  %v752_v58 = vpop.f32.mrb[14].mxu0  ;;  %v323_v60 = vsel %vm307_vm6, 0.0, %v898_v54 }
 0x15c   :  { %v900_v61 = vpop.eup %899  ;;  %v1187_v62 = vadd.f32 %v752_v58, %v123_v56  ;;  %v260_v63 = vpop.f32.mrb[15].mxu0  ;;  %360 = vperm.xlu1 %882, %v322_v59   ;;  %365 = vperm.xlu0 %881, %v323_v60  }
 0x15d   :  { %v902_v0 = vpop.eup %901  ;;  %v1189_v2 = vadd.f32 %v260_v63, %v122_v57  ;;  %vm310_vm9 = vcmp.ne.f32.partialorder %v900_v61, %v900_v61 }
 0x15e   :  { %911 = vrcp.f32 %v1187_v62  ;;  %vm309_vm8 = vcmp.ne.f32.partialorder %v902_v0, %v902_v0  ;;  %v326_v10 = vsel %vm310_vm9, 0.0, %v900_v61 }
 0x15f   :  { %913 = vrcp.f32 %v1189_v2  ;;  %v325_v5 = vsel %vm309_vm8, 0.0, %v902_v0 }
 0x160   :  { %v904_v6 = vpop.eup %903  ;;  %370 = vperm.xlu1 %882, %v324_v4   ;;  %375 = vperm.xlu0 %881, %v325_v5  }
 0x161   :  { %v906_v8 = vpop.eup %905  ;;  %vm312_vm11 = vcmp.ne.f32.partialorder %v904_v6, %v904_v6 }
 0x162   :  { %vm311_vm10 = vcmp.ne.f32.partialorder %v906_v8, %v906_v8  ;;  %v328_v16 = vsel %vm312_vm11, 0.0, %v904_v6 }
 0x163   :  { %v327_v11 = vsel %vm311_vm10, 0.0, %v906_v8 }
 0x164   :  { %v908_v12 = vpop.eup %907  ;;  %380 = vperm.xlu1 %882, %v326_v10   ;;  %385 = vperm.xlu0 %881, %v327_v11  }
 0x165   :  { %v910_v14 = vpop.eup %909  ;;  %vm314_vm13 = vcmp.ne.f32.partialorder %v908_v12, %v908_v12 }
 0x166   :  { %vm313_vm12 = vcmp.ne.f32.partialorder %v910_v14, %v910_v14  ;;  %v330_v21 = vsel %vm314_vm13, 0.0, %v908_v12 }
 0x167   :  { %v329_v17 = vsel %vm313_vm12, 0.0, %v910_v14 }
 0x168   :  { %v912_v18 = vpop.eup %911  ;;  %390 = vperm.xlu1 %882, %v328_v16   ;;  %395 = vperm.xlu0 %881, %v329_v17  }
 0x169   :  { %v914_v19 = vpop.eup %913  ;;  %vm316_vm15 = vcmp.ne.f32.partialorder %v912_v18, %v912_v18 }
 0x16a   :  { %vm315_vm14 = vcmp.ne.f32.partialorder %v914_v19, %v914_v19  ;;  %v332_v24 = vsel %vm316_vm15, 0.0, %v912_v18 }
 0x16b   :  { %v331_v22 = vsel %vm315_vm14, 0.0, %v914_v19 }
 0x16c   :  { %400 = vperm.xlu1 %882, %v330_v21   ;;  %405 = vperm.xlu0 %881, %v331_v22  }
 0x170   :  { %410 = vperm.xlu1 %882, %v332_v24  }
 0x1cf   :  { %v336_v25 = vpop.permute.xlu0 %335 }
 0x1d0   :  { %v413_v26 = vmul.f32 %v336_v25, %v1147_v3 }
 0x1d2   :  { %785 = vmatprep.mubr.f32.mxu1 %v413_v26 }
 0x1d3   :  { %v346_v27 = vpop.permute.xlu1 %345  ;;  %v341_v28 = vpop.permute.xlu0 %340 }
 0x1d4   :  { %v415_v29 = vmul.f32 %v346_v27, %v1153_v9  ;;  %v414_v30 = vmul.f32 %v341_v28, %v1145_v1 }
 0x1d6   :  { %786 = vmatmul.mubr.f32.vlgmr.msra.gmra.mrb[0].mxu1 %v414_v30 }
 0x1d7   :  { %v351_v32 = vpop.permute.xlu1 %350  ;;  %788 = vmatprep.mubr.f32.mxu1 %v415_v29  ;;  %v356_v33 = vpop.permute.xlu0 %355 }
 0x1d8   :  { %v416_v34 = vmul.f32 %v351_v32, %v1151_v7  ;;  %v417_v36 = vmul.f32 %v356_v33, %v1159_v15 }
 0x1da   :  { %789 = vmatmul.mubr.f32.gmra.mrb[2].mxu1 %v416_v34 }
 0x1db   :  { %v361_v37 = vpop.permute.xlu1 %360  ;;  %791 = vmatprep.mubr.f32.mxu1 %v417_v36  ;;  %v366_v38 = vpop.permute.xlu0 %365 }
 0x1dc   :  { %v418_v3 = vmul.f32 %v361_v37, %v1157_v13  ;;  %v419_v39 = vmul.f32 %v366_v38, %v1165_v23 }
 0x1de   :  { %792 = vmatmul.mubr.f32.gmra.mrb[4].mxu1 %v418_v3 }
 0x1df   :  { %v371_v9 = vpop.permute.xlu1 %370  ;;  %794 = vmatprep.mubr.f32.mxu1 %v419_v39  ;;  %v376_v1 = vpop.permute.xlu0 %375 }
 0x1e0   :  { %v420_v40 = vmul.f32 %v371_v9, %v1163_v20  ;;  %v421_v41 = vmul.f32 %v376_v1, %v1171_v35 }
 0x1e2   :  { %795 = vmatmul.mubr.f32.gmra.mrb[6].mxu1 %v420_v40 }
 0x1e3   :  { %v381_v7 = vpop.permute.xlu1 %380  ;;  %797 = vmatprep.mubr.f32.mxu1 %v421_v41  ;;  %v386_v15 = vpop.permute.xlu0 %385 }
 0x1e4   :  { %v422_v43 = vmul.f32 %v381_v7, %v1169_v31  ;;  %v423_v44 = vmul.f32 %v386_v15, %v1177_v45 }
 0x1e6   :  { %798 = vmatmul.mubr.f32.gmra.mrb[8].mxu1 %v422_v43 }
 0x1e7   :  { %v391_v13 = vpop.permute.xlu1 %390  ;;  %800 = vmatprep.mubr.f32.mxu1 %v423_v44  ;;  %v396_v23 = vpop.permute.xlu0 %395 }
 0x1e8   :  { %v424_v46 = vmul.f32 %v391_v13, %v1175_v42  ;;  %v425_v47 = vmul.f32 %v396_v23, %v1183_v55  ;;  %v632_v42 = vld [vmem:[%s1231_s4] ss:$0 sm:$0xff]  ;;  %s1040_s4 = smov [#allocation10]  }
 0x1e9   :  { %s618_s17 = sshll.u32 %s1040_s4, 4  ;;  %s619_s17 = int_to_ptr.vmem [resolvable:$true] %s618_s17 }
 0x1ea   :  { %801 = vmatmul.mubr.f32.gmra.mrb[10].mxu1 %v424_v46  ;;  %s1003_s18 = scalar_lea.vmem %s619_s17, 2048  ;;  %p1008_p5 = scmp.lt.s32.totalorder %s619_s17, %s619_s17 }
 0x1eb   :  { %v401_v20 = vpop.permute.xlu1 %400  ;;  %803 = vmatprep.mubr.f32.mxu1 %v425_v47  ;;  %v406_v35 = vpop.permute.xlu0 %405  ;;  %p1004_p4 = scmp.ne.s32.totalorder %s619_s17, %s1003_s18  ;;  %p1009_p6 = scmp.lt.s32.totalorder %s1003_s18, %s1003_s18 }
 0x1ec   :  { %v426_v48 = vmul.f32 %v401_v20, %v1181_v52  ;;  %v427_v49 = vmul.f32 %v406_v35, %v1189_v2 }
 0x1ed   :  { %p1010_p7 = por %p1009_p6, %p1008_p5 }
 0x1ee   :  { %804 = vmatmul.mubr.f32.gmra.mrb[12].mxu1 %v426_v48 }
 0x1ef   :  { %v411_v31 = vpop.permute.xlu1 %410  ;;  %806 = vmatprep.mubr.f32.mxu1 %v427_v49  ;;  %p1011_p8 = pnand %p1010_p7, %p1004_p4 }
 0x1f0   :  { %v428_v45 = vmul.f32 %v411_v31, %v1187_v62 }
 0x1f2   :  { %807 = vmatmul.mubr.f32.gmra.mrb[14].mxu1 %v428_v45 }
 0x2a9   :  { %v787_v50 = vpop.f32.mrb[0].mxu1 }
 0x2aa   :  { %v524_v51 = vadd.f32 %v787_v50, %v632_v42  ;;  %v518_v53 = vpop.f32.mrb[1].mxu1 }
 0x2ab   :  { %v519_v54 = vadd.f32 %v632_v42, %v518_v53 }
 0x2ac   :  { %598 = vst [vmem:[#allocation10 + $0x8] sm:$0xff] %v524_v51 }
 0x2ad   :  { %597 = vst [vmem:[#allocation10] sm:$0xff] %v519_v54  ;;  %v790_v55 = vpop.f32.mrb[2].mxu1 }
 0x2ae   :  { %v534_v52 = vadd.f32 %v790_v55, %v632_v42  ;;  %v528_v56 = vpop.f32.mrb[3].mxu1 }
 0x2af   :  { %v529_v57 = vadd.f32 %v632_v42, %v528_v56 }
 0x2b0   :  { %600 = vst [vmem:[#allocation10 + $0x18] sm:$0xff] %v534_v52 }
 0x2b1   :  { %599 = vst [vmem:[#allocation10 + $0x10] sm:$0xff] %v529_v57  ;;  %v793_v58 = vpop.f32.mrb[4].mxu1 }
 0x2b2   :  { %v544_v59 = vadd.f32 %v793_v58, %v632_v42  ;;  %v538_v60 = vpop.f32.mrb[5].mxu1 }
 0x2b3   :  { %v539_v61 = vadd.f32 %v632_v42, %v538_v60 }
 0x2b4   :  { %602 = vst [vmem:[#allocation10 + $0x28] sm:$0xff] %v544_v59 }
 0x2b5   :  { %601 = vst [vmem:[#allocation10 + $0x20] sm:$0xff] %v539_v61  ;;  %v796_v62 = vpop.f32.mrb[6].mxu1 }
 0x2b6   :  { %v554_v63 = vadd.f32 %v796_v62, %v632_v42  ;;  %v548_v0 = vpop.f32.mrb[7].mxu1 }
 0x2b7   :  { %v549_v2 = vadd.f32 %v632_v42, %v548_v0 }
 0x2b8   :  { %604 = vst [vmem:[#allocation10 + $0x38] sm:$0xff] %v554_v63 }
 0x2b9   :  { %603 = vst [vmem:[#allocation10 + $0x30] sm:$0xff] %v549_v2  ;;  %v799_v4 = vpop.f32.mrb[8].mxu1 }
 0x2ba   :  { %v564_v5 = vadd.f32 %v799_v4, %v632_v42  ;;  %v558_v6 = vpop.f32.mrb[9].mxu1 }
 0x2bb   :  { %v559_v8 = vadd.f32 %v632_v42, %v558_v6 }
 0x2bc   :  { %606 = vst [vmem:[#allocation10 + $0x48] sm:$0xff] %v564_v5 }
 0x2bd   :  { %605 = vst [vmem:[#allocation10 + $0x40] sm:$0xff] %v559_v8  ;;  %v802_v10 = vpop.f32.mrb[10].mxu1 }
 0x2be   :  { %v574_v11 = vadd.f32 %v802_v10, %v632_v42  ;;  %v568_v12 = vpop.f32.mrb[11].mxu1 }
 0x2bf   :  { %v569_v14 = vadd.f32 %v632_v42, %v568_v12 }
 0x2c0   :  { %608 = vst [vmem:[#allocation10 + $0x58] sm:$0xff] %v574_v11 }
 0x2c1   :  { %607 = vst [vmem:[#allocation10 + $0x50] sm:$0xff] %v569_v14  ;;  %v805_v16 = vpop.f32.mrb[12].mxu1 }
 0x2c2   :  { %v584_v17 = vadd.f32 %v805_v16, %v632_v42  ;;  %v578_v18 = vpop.f32.mrb[13].mxu1 }
 0x2c3   :  { %v579_v19 = vadd.f32 %v632_v42, %v578_v18 }
 0x2c4   :  { %610 = vst [vmem:[#allocation10 + $0x68] sm:$0xff] %v584_v17 }
 0x2c5   :  { %609 = vst [vmem:[#allocation10 + $0x60] sm:$0xff] %v579_v19  ;;  %v808_v21 = vpop.f32.mrb[14].mxu1 }
 0x2c6   :  { %v594_v22 = vadd.f32 %v808_v21, %v632_v42  ;;  %v588_v24 = vpop.f32.mrb[15].mxu1 }
 0x2c7   :  { %v589_v25 = vadd.f32 %v632_v42, %v588_v24 }
 0x2c8   :  { %612 = vst [vmem:[#allocation10 + $0x78] sm:$0xff] %v594_v22 }
 0x2c9   :  { %611 = vst [vmem:[#allocation10 + $0x70] sm:$0xff] %v589_v25 }
 0x2ca   :  { %1014 = shalt.err (!%p1011_p8)
}
 0x2cb   :  { %s1015_s22 = scalar_lea.hbm %s1232_s5, 2048 }
 0x2cc   :  { %p1016_p9 = scmp.ne.s32.totalorder %s1232_s5, %s1015_s22  ;;  %p1019_p10 = scmp.lt.u32.totalorder %s1015_s22, %s1232_s5 }
 0x2ce   :  { %p1021_p11 = pnand %p1019_p10, %p1016_p9 }
 0x2d0   :  { %1024 = shalt.err (!%p1021_p11)
}
 0x2d1   :  { %624 = dma.vmem_to_hbm [thread:$0]  %s619_s17, 2048, %s1232_s5, [#allocation4], %s1035_s30, %s1035_s30, %s1036_s6  }
 0x2d2   :  { %1031 = dma.done.wait [#allocation4], 2048  }
 0x2d3   :  { %1032 = vsyncadd [#allocation4], 4294965248 }
 0x2d4   :  { %628 = vsyncpa [#allocation3], 1 }
 0x2d5   :  { %629 = vsyncpa [#allocation6], 1 }
 0x2d6   :  { %630 = vsyncpa [#allocation9], 1 }
 0x2d7   :  { %631 = vsyncpa [#allocation4], 1 }

</bundles_post_ra>
